<compile_context>
chip_gen: v6e
topology: v6e:2x2x1
jax: 0.10.0
libtpu: 0.0.40
codegen_flags: <defaults>
</compile_context>

<pallas_src>
import jax
import jax.numpy as jnp
from jax.experimental import pallas as pl
from jax.experimental.pallas import tpu as pltpu


def _round_up(x, m):
    return ((x + m - 1) // m) * m


def _nbytes(a):
    return a.size * a.dtype.itemsize


def _fc_and_head(n_fc, u_mlp, i_mlp, u_mf, i_mf, w_refs, out_ref):
    """Shared math. Activations are f32, batch-on-lanes: (features, TB)."""
    f32 = jnp.float32
    # w_refs layout (all pre-transposed in the wrapper):
    #   [w1_u_T, w1_i_T, b1_T] + [(wl_T, bl_T)] * (n_fc - 1)
    #   + [w_aff_mlp_col, w_aff_mf_col, b_aff]
    w1_u = w_refs[0][...].astype(f32)            # (h1, d_mlp)
    w1_i = w_refs[1][...].astype(f32)            # (h1, d_mlp)
    b1 = w_refs[2][...].astype(f32)              # (h1, 1)
    # First FC: split matmul replaces cat([u_mlp, i_mlp], -1).
    h = (jnp.dot(w1_u, u_mlp, preferred_element_type=f32)
         + jnp.dot(w1_i, i_mlp, preferred_element_type=f32) + b1)
    h = jnp.maximum(h, 0.0)

    idx = 3
    for _ in range(1, n_fc):
        w = w_refs[idx][...].astype(f32)         # (out, in)
        b = w_refs[idx + 1][...].astype(f32)     # (out, 1)
        idx += 2
        h = jnp.maximum(jnp.dot(w, h, preferred_element_type=f32) + b, 0.0)

    # MF branch: elementwise product on the VPU in f32 (v5e-safe).
    mf = u_mf * i_mf                             # (d_mf, TB)

    w_aff_mlp = w_refs[idx][...].astype(f32)     # (h_last, 1)
    w_aff_mf = w_refs[idx + 1][...].astype(f32)  # (d_mf, 1)
    b_aff = w_refs[idx + 2][...].astype(f32)     # (1, 1)
    # Affine head as VPU multiply + sublane reduce -> lane-dense (1, TB) row;
    # keeps the degenerate M=1 matmul off the MXU and the store unmasked.
    logits = (jnp.sum(w_aff_mlp * h, axis=0, keepdims=True)
              + jnp.sum(w_aff_mf * mf, axis=0, keepdims=True) + b_aff)
    rating = 1.0 / (1.0 + jnp.exp(-logits))      # sigmoid, f32 EUP
    out_ref[...] = rating.astype(out_ref.dtype)


def make_neumf_kernel_fused(n_fc, num_users, num_items):
    """Kernel with the embedding gathers fused in (tables resident in VMEM)."""

    def kernel(u_idx_ref, i_idx_ref, tu_mlp_ref, ti_mlp_ref, tu_mf_ref,
               ti_mf_ref, *rest):
        out_ref = rest[-1]
        w_refs = rest[:-1]
        f32 = jnp.float32
        tb = u_idx_ref.shape[1]
        u_idx = u_idx_ref[...]                   # (1, TB) int32
        i_idx = i_idx_ref[...]

        def onehot(idx, n_rows, dtype):
            rows = jax.lax.broadcasted_iota(jnp.int32, (n_rows, tb), 0)
            return jnp.where(rows == idx, 1.0, 0.0).astype(dtype)

        # Gather = one-hot matmul on the MXU; exact (one nonzero per column).
        oh_u = onehot(u_idx, num_users, tu_mlp_ref.dtype)   # (num_users, TB)
        oh_i = onehot(i_idx, num_items, ti_mlp_ref.dtype)   # (num_items, TB)
        u_mlp = jnp.dot(tu_mlp_ref[...], oh_u, preferred_element_type=f32)
        u_mf = jnp.dot(tu_mf_ref[...], oh_u, preferred_element_type=f32)
        i_mlp = jnp.dot(ti_mlp_ref[...], oh_i, preferred_element_type=f32)
        i_mf = jnp.dot(ti_mf_ref[...], oh_i, preferred_element_type=f32)

        _fc_and_head(n_fc, u_mlp, i_mlp, u_mf, i_mf, w_refs, out_ref)

    return kernel


def make_neumf_kernel(n_fc):
    """Fallback kernel taking pre-gathered, feature-major activations."""

    def kernel(u_mlp_ref, i_mlp_ref, u_mf_ref, i_mf_ref, *rest):
        out_ref = rest[-1]
        w_refs = rest[:-1]
        f32 = jnp.float32
        _fc_and_head(
            n_fc,
            u_mlp_ref[...].astype(f32), i_mlp_ref[...].astype(f32),
            u_mf_ref[...].astype(f32), i_mf_ref[...].astype(f32),
            w_refs, out_ref)

    return kernel


def neumf_forward(user_indices, item_indices, params, *, batch_tile=8192,
                  fuse_gather=None, max_fused_table_rows=512):
    """NeuMF forward pass. Returns (B, 1) ratings in [0, 1]."""
    emb_u_mlp = params["emb_user_mlp"]
    emb_i_mlp = params["emb_item_mlp"]
    emb_u_mf = params["emb_user_mf"]
    emb_i_mf = params["emb_item_mf"]
    num_users, d_mlp = emb_u_mlp.shape
    num_items = emb_i_mlp.shape[0]
    d_mf = emb_u_mf.shape[1]
    n_fc = len(params["fc"])
    h_last = params["fc"][-1][0].shape[1]
    assert n_fc >= 1 and params["fc"][0][0].shape[0] == 2 * d_mlp

    B = user_indices.shape[0]

    # Balanced batch tiles on the lane axis (multiples of 128). Keep >= 2 grid
    # steps when the batch allows it so both v7x TensorCores get work.
    tb_max = max(128, _round_up(int(batch_tile), 128))
    n_tiles = -(-B // tb_max)
    if n_tiles == 1 and B > 256:
        n_tiles = 2
    TB = _round_up(-(-B // n_tiles), 128)
    B_pad = n_tiles * TB

    # Clamp (matches jnp.take's clamping) and pad indices; padded rows read
    # row 0 (valid) and are sliced off below.
    u_idx = jnp.clip(user_indices.astype(jnp.int32), 0, num_users - 1)
    i_idx = jnp.clip(item_indices.astype(jnp.int32), 0, num_items - 1)
    if B_pad != B:
        pad = jnp.zeros((B_pad - B,), jnp.int32)
        u_idx = jnp.concatenate([u_idx, pad])
        i_idx = jnp.concatenate([i_idx, pad])

    # Weights, transposed once for the batch-on-lanes dataflow; first FC and
    # affine head are split so the kernel needs no lane-axis concats.
    w1, b1 = params["fc"][0]
    w_args = [w1[:d_mlp].T, w1[d_mlp:].T, b1.reshape(-1, 1)]
    for w, b in params["fc"][1:]:
        w_args += [w.T, b.reshape(-1, 1)]
    w_aff = params["w_aff"]
    w_args += [w_aff[:h_last], w_aff[h_last:], params["b_aff"].reshape(1, 1)]

    if fuse_gather is None:
        fuse_gather = max(num_users, num_items) <= max_fused_table_rows

    def act_spec(d):
        return pl.BlockSpec((d, TB), lambda i: (0, i))

    def const_spec(a):
        # Whole array every step, constant block index -> resident in VMEM.
        return pl.BlockSpec(a.shape, lambda i: (0, 0))

    if fuse_gather:
        tables = [emb_u_mlp.T, emb_i_mlp.T, emb_u_mf.T, emb_i_mf.T]
        args = [u_idx.reshape(1, B_pad), i_idx.reshape(1, B_pad)] + tables + w_args
        in_specs = ([act_spec(1), act_spec(1)]
                    + [const_spec(a) for a in tables + w_args])
        kernel = make_neumf_kernel_fused(n_fc, num_users, num_items)
        per_tile_bytes = 2 * TB * 4
        resident_bytes = sum(_nbytes(a) for a in tables + w_args)
    else:
        # TODO(synk): for large tables, gather rows in-kernel via scalar-prefetched
        # indices + manual make_async_copy from HBM instead of this XLA gather.
        acts = [jnp.take(emb_u_mlp, u_idx, axis=0).T,
                jnp.take(emb_i_mlp, i_idx, axis=0).T,
                jnp.take(emb_u_mf, u_idx, axis=0).T,
                jnp.take(emb_i_mf, i_idx, axis=0).T]
        args = acts + w_args
        in_specs = ([act_spec(d_mlp), act_spec(d_mlp),
                     act_spec(d_mf), act_spec(d_mf)]
                    + [const_spec(a) for a in w_args])
        kernel = make_neumf_kernel(n_fc)
        per_tile_bytes = sum(_nbytes(a) for a in acts) // n_tiles
        resident_bytes = sum(_nbytes(a) for a in w_args)

    # Double-buffered per-tile blocks + resident consts + output row, with slack.
    est = 2 * (per_tile_bytes + TB * 4) + 2 * resident_bytes
    vmem_limit = int(min(32 * 1024 * 1024, max(16 * 1024 * 1024, 2 * est)))

    out = pl.pallas_call(
        kernel,
        out_shape=jax.ShapeDtypeStruct((1, B_pad), jnp.float32),
        grid=(n_tiles,),
        in_specs=in_specs,
        out_specs=pl.BlockSpec((1, TB), lambda i: (0, i)),
        compiler_params=pltpu.CompilerParams(
            dimension_semantics=("parallel",),  # shard batch tiles on v7x's 2 TCs
            vmem_limit_bytes=vmem_limit,
        ),
    )(*args)
    return out[0, :B][:, None]


def init_params(key, num_users, num_items, latent_dim_mlp, latent_dim_mf, layers,
                dtype=jnp.bfloat16):
    """Deterministic synthetic parameters (shapes match NeuMF.__init__).

    bf16 storage halves HBM traffic; all kernel math is done in f32.
    """
    n_fc = len(layers) - 1
    keys = jax.random.split(key, 6 + 2 * n_fc)
    params = {}
    params["emb_user_mlp"] = (
        jax.random.normal(keys[0], (num_users, latent_dim_mlp), jnp.float32) * 0.1
    ).astype(dtype)
    params["emb_item_mlp"] = (
        jax.random.normal(keys[1], (num_items, latent_dim_mlp), jnp.float32) * 0.1
    ).astype(dtype)
    params["emb_user_mf"] = (
        jax.random.normal(keys[2], (num_users, latent_dim_mf), jnp.float32) * 0.1
    ).astype(dtype)
    params["emb_item_mf"] = (
        jax.random.normal(keys[3], (num_items, latent_dim_mf), jnp.float32) * 0.1
    ).astype(dtype)

    fc = []
    for idx, (in_size, out_size) in enumerate(zip(layers[:-1], layers[1:])):
        kw, kb = jax.random.split(keys[4 + idx])
        w = jax.random.normal(kw, (in_size, out_size), jnp.float32) * (1.0 / in_size**0.5)
        b = jax.random.normal(kb, (1, out_size), jnp.float32) * 0.01
        fc.append((w.astype(dtype), b.astype(dtype)))
    params["fc"] = fc

    aff_in = layers[-1] + latent_dim_mf
    params["w_aff"] = (
        jax.random.normal(keys[4 + n_fc], (aff_in, 1), jnp.float32) * (1.0 / aff_in**0.5)
    ).astype(dtype)
    params["b_aff"] = (
        jax.random.normal(keys[5 + n_fc], (1, 1), jnp.float32) * 0.01
    ).astype(dtype)
    return params


def neumf_reference(user_indices, item_indices, params):
    """Pure-JAX reference of the PyTorch forward (f32 math on the stored params)."""
    u_mlp = jnp.take(params["emb_user_mlp"], user_indices, axis=0).astype(jnp.float32)
    i_mlp = jnp.take(params["emb_item_mlp"], item_indices, axis=0).astype(jnp.float32)
    u_mf = jnp.take(params["emb_user_mf"], user_indices, axis=0).astype(jnp.float32)
    i_mf = jnp.take(params["emb_item_mf"], item_indices, axis=0).astype(jnp.float32)
    mlp = jnp.concatenate([u_mlp, i_mlp], axis=-1)
    mf = u_mf * i_mf
    for w, b in params["fc"]:
        mlp = jnp.maximum(mlp @ w.astype(jnp.float32) + b.astype(jnp.float32), 0.0)
    vec = jnp.concatenate([mlp, mf], axis=-1)
    logits = vec @ params["w_aff"].astype(jnp.float32) + params["b_aff"].astype(jnp.float32)
    return jax.nn.sigmoid(logits)


if __name__ == "__main__":
    # Small NeuMF config (layers[0] must equal 2 * latent_dim_mlp).
    config = {"latent_dim_mlp": 16, "latent_dim_mf": 8, "layers": [32, 16, 8]}
    num_users, num_items = 32, 48

    key = jax.random.PRNGKey(0)
    k_param, k_user, k_item = jax.random.split(key, 3)
    params = init_params(k_param, num_users, num_items,
                         config["latent_dim_mlp"], config["latent_dim_mf"],
                         config["layers"], dtype=jnp.bfloat16)

    def check(batch, batch_tile, fuse_gather):
        ku = jax.random.fold_in(k_user, batch)
        ki = jax.random.fold_in(k_item, batch)
        u = jax.random.randint(ku, (batch,), 0, num_users, dtype=jnp.int32)
        it = jax.random.randint(ki, (batch,), 0, num_items, dtype=jnp.int32)
        got = neumf_forward(u, it, params, batch_tile=batch_tile,
                            fuse_gather=fuse_gather)
        got = jax.block_until_ready(got)
        ref = neumf_reference(u, it, params)
        assert got.shape == (batch, 1)
        assert jnp.allclose(got, ref, atol=2e-3, rtol=2e-3), (
            float(jnp.max(jnp.abs(got - ref))))

    # Fused gather, single tile (batch not a multiple of the lane width).
    check(batch=10, batch_tile=8192, fuse_gather=True)
    # Fused gather, multi-tile grid (exercises the parallel batch axis).
    check(batch=300, batch_tile=128, fuse_gather=True)
    # Pre-gathered fallback (used when embedding tables don't fit VMEM).
    check(batch=300, batch_tile=128, fuse_gather=False)

    print("KERNEL_OK")
</pallas_src>

<mosaic_0001>
module attributes {stable_mosaic.version = 11 : i64} {
  func.func @kernel(%arg0: i32, %arg1: memref<1x128xi32, #tpu.memory_space<vmem>>, %arg2: memref<1x128xi32, #tpu.memory_space<vmem>>, %arg3: memref<16x32xbf16, #tpu.memory_space<vmem>>, %arg4: memref<16x48xbf16, #tpu.memory_space<vmem>>, %arg5: memref<8x32xbf16, #tpu.memory_space<vmem>>, %arg6: memref<8x48xbf16, #tpu.memory_space<vmem>>, %arg7: memref<16x16xbf16, #tpu.memory_space<vmem>>, %arg8: memref<16x16xbf16, #tpu.memory_space<vmem>>, %arg9: memref<16x1xbf16, #tpu.memory_space<vmem>>, %arg10: memref<8x16xbf16, #tpu.memory_space<vmem>>, %arg11: memref<8x1xbf16, #tpu.memory_space<vmem>>, %arg12: memref<8x1xbf16, #tpu.memory_space<vmem>>, %arg13: memref<8x1xbf16, #tpu.memory_space<vmem>>, %arg14: memref<1x1xbf16, #tpu.memory_space<vmem>>, %arg15: memref<1x128xf32, #tpu.memory_space<vmem>>) attributes {dimension_semantics = [#tpu.dimension_semantics<parallel>], iteration_bounds = array<i64: 1>, scalar_prefetch = 0 : i64, scratch_operands = 0 : i64, tpu.core_type = #tpu.core_type<tc>, window_params = [{transform_indices = @transform_0, window_bounds = array<i64: 1, 128>}, {transform_indices = @transform_1, window_bounds = array<i64: 1, 128>}, {pipeline_mode = #tpu.pipeline_mode<synchronous>, transform_indices = @transform_2, window_bounds = array<i64: 16, 32>}, {pipeline_mode = #tpu.pipeline_mode<synchronous>, transform_indices = @transform_3, window_bounds = array<i64: 16, 48>}, {pipeline_mode = #tpu.pipeline_mode<synchronous>, transform_indices = @transform_4, window_bounds = array<i64: 8, 32>}, {pipeline_mode = #tpu.pipeline_mode<synchronous>, transform_indices = @transform_5, window_bounds = array<i64: 8, 48>}, {pipeline_mode = #tpu.pipeline_mode<synchronous>, transform_indices = @transform_6, window_bounds = array<i64: 16, 16>}, {pipeline_mode = #tpu.pipeline_mode<synchronous>, transform_indices = @transform_7, window_bounds = array<i64: 16, 16>}, {pipeline_mode = #tpu.pipeline_mode<synchronous>, transform_indices = @transform_8, window_bounds = array<i64: 16, 1>}, {pipeline_mode = #tpu.pipeline_mode<synchronous>, transform_indices = @transform_9, window_bounds = array<i64: 8, 16>}, {pipeline_mode = #tpu.pipeline_mode<synchronous>, transform_indices = @transform_10, window_bounds = array<i64: 8, 1>}, {pipeline_mode = #tpu.pipeline_mode<synchronous>, transform_indices = @transform_11, window_bounds = array<i64: 8, 1>}, {pipeline_mode = #tpu.pipeline_mode<synchronous>, transform_indices = @transform_12, window_bounds = array<i64: 8, 1>}, {pipeline_mode = #tpu.pipeline_mode<synchronous>, transform_indices = @transform_13, window_bounds = array<i64: 1, 1>}, {transform_indices = @transform_14, window_bounds = array<i64: 1, 128>}]} {
    %c0 = arith.constant 0 : index
    %c0_0 = arith.constant 0 : index
    %0 = vector.load %arg1[%c0, %c0_0] : memref<1x128xi32, #tpu.memory_space<vmem>>, vector<1x128xi32>
    %c0_1 = arith.constant 0 : index
    %c0_2 = arith.constant 0 : index
    %1 = vector.load %arg2[%c0_1, %c0_2] : memref<1x128xi32, #tpu.memory_space<vmem>>, vector<1x128xi32>
    %2 = tpu.iota {dimensions = array<i32: 0>} : vector<32x128xi32>
    %3 = vector.broadcast %0 : vector<1x128xi32> to vector<32x128xi32>
    %4 = arith.cmpi eq, %2, %3 : vector<32x128xi32>
    %cst = arith.constant 1.000000e+00 : f32
    %cst_3 = arith.constant 0.000000e+00 : f32
    %5 = vector.broadcast %cst : f32 to vector<32x128xf32>
    %6 = vector.broadcast %cst_3 : f32 to vector<32x128xf32>
    %7 = arith.select %4, %5, %6 : vector<32x128xi1>, vector<32x128xf32>
    %8 = arith.truncf %7 : vector<32x128xf32> to vector<32x128xbf16>
    %9 = tpu.iota {dimensions = array<i32: 0>} : vector<48x128xi32>
    %10 = vector.broadcast %1 : vector<1x128xi32> to vector<48x128xi32>
    %11 = arith.cmpi eq, %9, %10 : vector<48x128xi32>
    %cst_4 = arith.constant 1.000000e+00 : f32
    %cst_5 = arith.constant 0.000000e+00 : f32
    %12 = vector.broadcast %cst_4 : f32 to vector<48x128xf32>
    %13 = vector.broadcast %cst_5 : f32 to vector<48x128xf32>
    %14 = arith.select %11, %12, %13 : vector<48x128xi1>, vector<48x128xf32>
    %15 = arith.truncf %14 : vector<48x128xf32> to vector<48x128xbf16>
    %c0_6 = arith.constant 0 : index
    %c0_7 = arith.constant 0 : index
    %16 = vector.load %arg3[%c0_6, %c0_7] : memref<16x32xbf16, #tpu.memory_space<vmem>>, vector<16x32xbf16>
    %cst_8 = arith.constant dense<0.000000e+00> : vector<16x128xf32>
    %17 = tpu.matmul %16, %8, %cst_8 {dimension_numbers = #tpu.dot_dimension_numbers<[1], [0], [0], [1], [0, 0, 1, 1], [], []>} : vector<16x32xbf16>, vector<32x128xbf16>, vector<16x128xf32> -> vector<16x128xf32>
    %c0_9 = arith.constant 0 : index
    %c0_10 = arith.constant 0 : index
    %18 = vector.load %arg5[%c0_9, %c0_10] : memref<8x32xbf16, #tpu.memory_space<vmem>>, vector<8x32xbf16>
    %cst_11 = arith.constant dense<0.000000e+00> : vector<8x128xf32>
    %19 = tpu.matmul %18, %8, %cst_11 {dimension_numbers = #tpu.dot_dimension_numbers<[1], [0], [0], [1], [0, 0, 1, 1], [], []>} : vector<8x32xbf16>, vector<32x128xbf16>, vector<8x128xf32> -> vector<8x128xf32>
    %c0_12 = arith.constant 0 : index
    %c0_13 = arith.constant 0 : index
    %20 = vector.load %arg4[%c0_12, %c0_13] : memref<16x48xbf16, #tpu.memory_space<vmem>>, vector<16x48xbf16>
    %cst_14 = arith.constant dense<0.000000e+00> : vector<16x128xf32>
    %21 = tpu.matmul %20, %15, %cst_14 {dimension_numbers = #tpu.dot_dimension_numbers<[1], [0], [0], [1], [0, 0, 1, 1], [], []>} : vector<16x48xbf16>, vector<48x128xbf16>, vector<16x128xf32> -> vector<16x128xf32>
    %c0_15 = arith.constant 0 : index
    %c0_16 = arith.constant 0 : index
    %22 = vector.load %arg6[%c0_15, %c0_16] : memref<8x48xbf16, #tpu.memory_space<vmem>>, vector<8x48xbf16>
    %cst_17 = arith.constant dense<0.000000e+00> : vector<8x128xf32>
    %23 = tpu.matmul %22, %15, %cst_17 {dimension_numbers = #tpu.dot_dimension_numbers<[1], [0], [0], [1], [0, 0, 1, 1], [], []>} : vector<8x48xbf16>, vector<48x128xbf16>, vector<8x128xf32> -> vector<8x128xf32>
    %c0_18 = arith.constant 0 : index
    %c0_19 = arith.constant 0 : index
    %24 = vector.load %arg7[%c0_18, %c0_19] : memref<16x16xbf16, #tpu.memory_space<vmem>>, vector<16x16xbf16>
    %25 = arith.extf %24 : vector<16x16xbf16> to vector<16x16xf32>
    %c0_20 = arith.constant 0 : index
    %c0_21 = arith.constant 0 : index
    %26 = vector.load %arg8[%c0_20, %c0_21] : memref<16x16xbf16, #tpu.memory_space<vmem>>, vector<16x16xbf16>
    %27 = arith.extf %26 : vector<16x16xbf16> to vector<16x16xf32>
    %c0_22 = arith.constant 0 : index
    %c0_23 = arith.constant 0 : index
    %28 = vector.load %arg9[%c0_22, %c0_23] : memref<16x1xbf16, #tpu.memory_space<vmem>>, vector<16x1xbf16>
    %29 = arith.extf %28 : vector<16x1xbf16> to vector<16x1xf32>
    %cst_24 = arith.constant dense<0.000000e+00> : vector<16x128xf32>
    %30 = tpu.matmul %25, %17, %cst_24 {dimension_numbers = #tpu.dot_dimension_numbers<[1], [0], [0], [1], [0, 0, 1, 1], [], []>} : vector<16x16xf32>, vector<16x128xf32>, vector<16x128xf32> -> vector<16x128xf32>
    %cst_25 = arith.constant dense<0.000000e+00> : vector<16x128xf32>
    %31 = tpu.matmul %27, %21, %cst_25 {dimension_numbers = #tpu.dot_dimension_numbers<[1], [0], [0], [1], [0, 0, 1, 1], [], []>} : vector<16x16xf32>, vector<16x128xf32>, vector<16x128xf32> -> vector<16x128xf32>
    %32 = arith.addf %30, %31 : vector<16x128xf32>
    %33 = vector.broadcast %29 : vector<16x1xf32> to vector<16x128xf32>
    %34 = arith.addf %32, %33 : vector<16x128xf32>
    %cst_26 = arith.constant 0.000000e+00 : f32
    %35 = vector.broadcast %cst_26 : f32 to vector<16x128xf32>
    %36 = arith.maximumf %34, %35 : vector<16x128xf32>
    %c0_27 = arith.constant 0 : index
    %c0_28 = arith.constant 0 : index
    %37 = vector.load %arg10[%c0_27, %c0_28] : memref<8x16xbf16, #tpu.memory_space<vmem>>, vector<8x16xbf16>
    %38 = arith.extf %37 : vector<8x16xbf16> to vector<8x16xf32>
    %c0_29 = arith.constant 0 : index
    %c0_30 = arith.constant 0 : index
    %39 = vector.load %arg11[%c0_29, %c0_30] : memref<8x1xbf16, #tpu.memory_space<vmem>>, vector<8x1xbf16>
    %40 = arith.extf %39 : vector<8x1xbf16> to vector<8x1xf32>
    %cst_31 = arith.constant dense<0.000000e+00> : vector<8x128xf32>
    %41 = tpu.matmul %38, %36, %cst_31 {dimension_numbers = #tpu.dot_dimension_numbers<[1], [0], [0], [1], [0, 0, 1, 1], [], []>} : vector<8x16xf32>, vector<16x128xf32>, vector<8x128xf32> -> vector<8x128xf32>
    %42 = vector.broadcast %40 : vector<8x1xf32> to vector<8x128xf32>
    %43 = arith.addf %41, %42 : vector<8x128xf32>
    %cst_32 = arith.constant 0.000000e+00 : f32
    %44 = vector.broadcast %cst_32 : f32 to vector<8x128xf32>
    %45 = arith.maximumf %43, %44 : vector<8x128xf32>
    %46 = arith.mulf %19, %23 : vector<8x128xf32>
    %c0_33 = arith.constant 0 : index
    %c0_34 = arith.constant 0 : index
    %47 = vector.load %arg12[%c0_33, %c0_34] : memref<8x1xbf16, #tpu.memory_space<vmem>>, vector<8x1xbf16>
    %48 = arith.extf %47 : vector<8x1xbf16> to vector<8x1xf32>
    %c0_35 = arith.constant 0 : index
    %c0_36 = arith.constant 0 : index
    %49 = vector.load %arg13[%c0_35, %c0_36] : memref<8x1xbf16, #tpu.memory_space<vmem>>, vector<8x1xbf16>
    %50 = arith.extf %49 : vector<8x1xbf16> to vector<8x1xf32>
    %c0_37 = arith.constant 0 : index
    %c0_38 = arith.constant 0 : index
    %51 = vector.load %arg14[%c0_37, %c0_38] : memref<1x1xbf16, #tpu.memory_space<vmem>>, vector<1x1xbf16>
    %52 = arith.extf %51 : vector<1x1xbf16> to vector<1x1xf32>
    %53 = vector.broadcast %48 : vector<8x1xf32> to vector<8x128xf32>
    %54 = arith.mulf %53, %45 : vector<8x128xf32>
    %cst_39 = arith.constant dense<0.000000e+00> : vector<128xf32>
    %55 = vector.multi_reduction <add>, %54, %cst_39 [0] : vector<8x128xf32> to vector<128xf32>
    %56 = vector.shape_cast %55 : vector<128xf32> to vector<1x128xf32>
    %57 = vector.broadcast %50 : vector<8x1xf32> to vector<8x128xf32>
    %58 = arith.mulf %57, %46 : vector<8x128xf32>
    %cst_40 = arith.constant dense<0.000000e+00> : vector<128xf32>
    %59 = vector.multi_reduction <add>, %58, %cst_40 [0] : vector<8x128xf32> to vector<128xf32>
    %60 = vector.shape_cast %59 : vector<128xf32> to vector<1x128xf32>
    %61 = arith.addf %56, %60 : vector<1x128xf32>
    %62 = vector.broadcast %52 : vector<1x1xf32> to vector<1x128xf32>
    %63 = arith.addf %61, %62 : vector<1x128xf32>
    %cst_41 = arith.constant 0.000000e+00 : f32
    %64 = vector.broadcast %cst_41 : f32 to vector<1x128xf32>
    %65 = arith.subf %64, %63 : vector<1x128xf32>
    %66 = math.exp %65 : vector<1x128xf32>
    %cst_42 = arith.constant 1.000000e+00 : f32
    %67 = vector.broadcast %cst_42 : f32 to vector<1x128xf32>
    %68 = arith.addf %67, %66 : vector<1x128xf32>
    %cst_43 = arith.constant 1.000000e+00 : f32
    %69 = vector.broadcast %cst_43 : f32 to vector<1x128xf32>
    %70 = arith.divf %69, %68 : vector<1x128xf32>
    %c0_44 = arith.constant 0 : index
    %c0_45 = arith.constant 0 : index
    %71 = vector.load %arg15[%c0_44, %c0_45] : memref<1x128xf32, #tpu.memory_space<vmem>>, vector<1x128xf32>
    tpu.vector_store %arg15[%c0_44, %c0_45], %70 {strides = array<i32>} : memref<1x128xf32, #tpu.memory_space<vmem>>, vector<1x128xf32>,
    return
  }
  func.func @transform_0(%arg0: i32) -> (i32, i32) {
    %c0_i32 = arith.constant 0 : i32
    %c0_i32_0 = arith.constant 0 : i32
    return %c0_i32, %arg0 : i32, i32
  }
  func.func @transform_1(%arg0: i32) -> (i32, i32) {
    %c0_i32 = arith.constant 0 : i32
    %c0_i32_0 = arith.constant 0 : i32
    return %c0_i32, %arg0 : i32, i32
  }
  func.func @transform_2(%arg0: i32) -> (i32, i32) {
    %c0_i32 = arith.constant 0 : i32
    %c0_i32_0 = arith.constant 0 : i32
    %c0_i32_1 = arith.constant 0 : i32
    return %c0_i32, %c0_i32_0 : i32, i32
  }
  func.func @transform_3(%arg0: i32) -> (i32, i32) {
    %c0_i32 = arith.constant 0 : i32
    %c0_i32_0 = arith.constant 0 : i32
    %c0_i32_1 = arith.constant 0 : i32
    return %c0_i32, %c0_i32_0 : i32, i32
  }
  func.func @transform_4(%arg0: i32) -> (i32, i32) {
    %c0_i32 = arith.constant 0 : i32
    %c0_i32_0 = arith.constant 0 : i32
    %c0_i32_1 = arith.constant 0 : i32
    return %c0_i32, %c0_i32_0 : i32, i32
  }
  func.func @transform_5(%arg0: i32) -> (i32, i32) {
    %c0_i32 = arith.constant 0 : i32
    %c0_i32_0 = arith.constant 0 : i32
    %c0_i32_1 = arith.constant 0 : i32
    return %c0_i32, %c0_i32_0 : i32, i32
  }
  func.func @transform_6(%arg0: i32) -> (i32, i32) {
    %c0_i32 = arith.constant 0 : i32
    %c0_i32_0 = arith.constant 0 : i32
    %c0_i32_1 = arith.constant 0 : i32
    return %c0_i32, %c0_i32_0 : i32, i32
  }
  func.func @transform_7(%arg0: i32) -> (i32, i32) {
    %c0_i32 = arith.constant 0 : i32
    %c0_i32_0 = arith.constant 0 : i32
    %c0_i32_1 = arith.constant 0 : i32
    return %c0_i32, %c0_i32_0 : i32, i32
  }
  func.func @transform_8(%arg0: i32) -> (i32, i32) {
    %c0_i32 = arith.constant 0 : i32
    %c0_i32_0 = arith.constant 0 : i32
    %c0_i32_1 = arith.constant 0 : i32
    return %c0_i32, %c0_i32_0 : i32, i32
  }
  func.func @transform_9(%arg0: i32) -> (i32, i32) {
    %c0_i32 = arith.constant 0 : i32
    %c0_i32_0 = arith.constant 0 : i32
    %c0_i32_1 = arith.constant 0 : i32
    return %c0_i32, %c0_i32_0 : i32, i32
  }
  func.func @transform_10(%arg0: i32) -> (i32, i32) {
    %c0_i32 = arith.constant 0 : i32
    %c0_i32_0 = arith.constant 0 : i32
    %c0_i32_1 = arith.constant 0 : i32
    return %c0_i32, %c0_i32_0 : i32, i32
  }
  func.func @transform_11(%arg0: i32) -> (i32, i32) {
    %c0_i32 = arith.constant 0 : i32
    %c0_i32_0 = arith.constant 0 : i32
    %c0_i32_1 = arith.constant 0 : i32
    return %c0_i32, %c0_i32_0 : i32, i32
  }
  func.func @transform_12(%arg0: i32) -> (i32, i32) {
    %c0_i32 = arith.constant 0 : i32
    %c0_i32_0 = arith.constant 0 : i32
    %c0_i32_1 = arith.constant 0 : i32
    return %c0_i32, %c0_i32_0 : i32, i32
  }
  func.func @transform_13(%arg0: i32) -> (i32, i32) {
    %c0_i32 = arith.constant 0 : i32
    %c0_i32_0 = arith.constant 0 : i32
    %c0_i32_1 = arith.constant 0 : i32
    return %c0_i32, %c0_i32_0 : i32, i32
  }
  func.func @transform_14(%arg0: i32) -> (i32, i32) {
    %c0_i32 = arith.constant 0 : i32
    %c0_i32_0 = arith.constant 0 : i32
    return %c0_i32, %arg0 : i32, i32
  }
}

</mosaic_0001>

<bundles_post_ra>
// kernel: tpu_custom_call.1
= control target key start
LH: loop header
LB: loop body
LE: loop exit
PB: predicated region body
PF: predicated region fallthrough
CT: control target
= control target key end

     0   :  { %s1098_s0 = inlined_call_operand.hbm [shape: s32[1,128], index: 0, kind: input, shape index: {}]   ;;  %s1099_s1 = inlined_call_operand.hbm [shape: s32[1,128], index: 1, kind: input, shape index: {}]   ;;  %s1100_s2 = inlined_call_operand.vmem [shape: bf16[16,32], index: 2, kind: input, shape index: {}]   ;;  %s1101_s3 = inlined_call_operand.vmem [shape: bf16[16,48], index: 3, kind: input, shape index: {}]   ;;  %s1102_s4 = inlined_call_operand.hbm [shape: bf16[8,32], index: 4, kind: input, shape index: {}]   ;;  %s1103_s5 = inlined_call_operand.hbm [shape: bf16[8,48], index: 5, kind: input, shape index: {}]   ;;  %s1104_s6 = inlined_call_operand.vmem [shape: bf16[16,16], index: 6, kind: input, shape index: {}]   ;;  %s1105_s7 = inlined_call_operand.vmem [shape: bf16[16,16], index: 7, kind: input, shape index: {}]   ;;  %s1106_s8 = inlined_call_operand.vmem [shape: bf16[16,1], index: 8, kind: input, shape index: {}]   ;;  %s1107_s9 = inlined_call_operand.vmem [shape: bf16[8,16], index: 9, kind: input, shape index: {}]   ;;  %s1108_s10 = inlined_call_operand.vmem [shape: bf16[8,1], index: 10, kind: input, shape index: {}]   ;;  %s1109_s11 = inlined_call_operand.vmem [shape: bf16[8,1], index: 11, kind: input, shape index: {}]   ;;  %s1110_s12 = inlined_call_operand.vmem [shape: bf16[8,1], index: 12, kind: input, shape index: {}]   ;;  %s1111_s13 = inlined_call_operand.<no memory space> [shape: bf16[1,1], index: 13, kind: input, shape index: {}]   ;;  %s1112_s14 = inlined_call_operand.hbm [shape: f32[1,128], index: 14, kind: output, shape index: {}]  }
   0x1   :  { %v19_v0 = vstv %s1111_s13 }
   0x2   :  { %20 = vst [vmem:[#allocation2] sm:$0x1] %v19_v0 }
   0x3   :  { %21 = vsyncpa [#allocation4], 0 }
   0x4   :  { %22 = vsyncpa [#allocation7], 0 }
   0x5   :  { %23 = vsyncpa [#allocation10], 0 }
   0x6   :  { %24 = vsyncpa [#allocation5], 0  ;;  %s931_s15 = smov [#allocation6]   ;;  %s932_s17 = smov [#allocation3]  }
   0x7   :  { %s41_s16 = sshll.u32 %s931_s15, 4  ;;  %s31_s18 = sshll.u32 %s932_s17, 4  ;;  %s42_s16 = int_to_ptr.vmem [resolvable:$true] %s41_s16  ;;  %s32_s18 = int_to_ptr.vmem [resolvable:$true] %s31_s18 }
   0x8   :  { %s831_s19 = scalar_lea.vmem %s42_s16, 16  ;;  %s835_s20 = scalar_lea.vmem %s42_s16, 32 }
   0x9   :  { %p832_p0 = scmp.ne.s32.totalorder %s42_s16, %s831_s19  ;;  %p836_p1 = scmp.lt.s32.totalorder %s42_s16, %s42_s16 }
   0xa   :  { %p837_p2 = scmp.lt.s32.totalorder %s835_s20, %s831_s19 }
   0xc   :  { %p838_p3 = por %p837_p2, %p836_p1 }
   0xe   :  { %p839_p4 = pnand %p838_p3, %p832_p0 }
  0x10   :  { %842 = shalt.err (!%p839_p4)
}
  0x11   :  { %44 = dma.hbm_to_vmem [thread:$0]  %s1099_s1, 16, %s42_s16, [#allocation7]  }
  0x12   :  { %s851_s22 = scalar_lea.vmem %s32_s18, 16  ;;  %s855_s23 = scalar_lea.vmem %s32_s18, 32 }
  0x13   :  { %p852_p5 = scmp.ne.s32.totalorder %s32_s18, %s851_s22  ;;  %p856_p6 = scmp.lt.s32.totalorder %s32_s18, %s32_s18 }
  0x14   :  { %p857_p7 = scmp.lt.s32.totalorder %s855_s23, %s851_s22 }
  0x16   :  { %p858_p8 = por %p857_p7, %p856_p6 }
  0x18   :  { %p859_p9 = pnand %p858_p8, %p852_p5 }
  0x1a   :  { %862 = shalt.err (!%p859_p9)
}
  0x1b   :  { %34 = dma.hbm_to_vmem [thread:$0]  %s1098_s0, 16, %s32_s18, [#allocation4]  }
  0x1c   :  { %s933_s26 = smov [#allocation8]   ;;  %s934_s28 = smov [#allocation9]  }
  0x1d   :  { %s55_s27 = sshll.u32 %s933_s26, 4  ;;  %s65_s29 = sshll.u32 %s934_s28, 4  ;;  %s56_s27 = int_to_ptr.vmem [resolvable:$true] %s55_s27  ;;  %s66_s29 = int_to_ptr.vmem [resolvable:$true] %s65_s29 }
  0x1e   :  { %s871_s30 = scalar_lea.vmem %s56_s27, 64  ;;  %p876_p11 = scmp.lt.s32.totalorder %s56_s27, %s56_s27 }
  0x1f   :  { %p872_p10 = scmp.ne.s32.totalorder %s56_s27, %s871_s30  ;;  %p877_p12 = scmp.lt.s32.totalorder %s871_s30, %s871_s30 }
  0x21   :  { %p878_p13 = por %p877_p12, %p876_p11 }
  0x23   :  { %p879_p0 = pnand %p878_p13, %p872_p10 }
  0x25   :  { %882 = shalt.err (!%p879_p0)
}
  0x26   :  { %58 = dma.hbm_to_vmem [thread:$0]  %s1102_s4, 64, %s56_s27, [#allocation7]  }
  0x27   :  { %s891_s16 = scalar_lea.vmem %s66_s29, 64  ;;  %p896_p2 = scmp.lt.s32.totalorder %s66_s29, %s66_s29 }
  0x28   :  { %p892_p1 = scmp.ne.s32.totalorder %s66_s29, %s891_s16  ;;  %p897_p3 = scmp.lt.s32.totalorder %s891_s16, %s891_s16 }
  0x2a   :  { %p898_p4 = por %p897_p3, %p896_p2 }
  0x2c   :  { %p899_p5 = pnand %p898_p4, %p892_p1 }
  0x2e   :  { %902 = shalt.err (!%p899_p5)
}
  0x2f   :  { %68 = dma.hbm_to_vmem [thread:$0]  %s1103_s5, 64, %s66_s29, [#allocation10]  }
  0x30   :  { %923 = dma.done.wait [#allocation4], 16  }
  0x31   :  { %924 = vsyncadd [#allocation4], 4294967280 }
  0x32   :  { %925 = dma.done.wait [#allocation7], 80  }
  0x33   :  { %926 = vsyncadd [#allocation7], 4294967216 }
  0x34   :  { %927 = dma.done.wait [#allocation10], 64  }
  0x35   :  { %928 = vsyncadd [#allocation10], 4294967232  ;;  %v100_v1 = vlaneseq  ;;  %v935_v2 = vmov 0.0   ;;  %vm936_vm0 = vmmov 0   ;;  %v673_v9 = vld [vmem:[#allocation3] ss:$0 sm:$0xff] }
  0x36   :  { %743 = vmatprep.subr.bf16.mxu0 %v935_v2  ;;  %747 = vmatprep.mubr.msk.bf16.mxu0 %vm936_vm0, %v935_v2  ;;  %v674_v10 = vld [vmem:[#allocation6] ss:$0 sm:$0xff]  ;;  %v937_v11 = vmov 1.0|1.0   ;;  %vm147_vm9 = vcmask 261120   ;;  %v938_v23 = vmov 0  }
  0x37   :  { %v1034_v3 = vshrl.u32 %v100_v1, 7  ;;  %751 = vmatprep.subr.bf16.mxu1 %v935_v2  ;;  %755 = vmatprep.mubr.msk.bf16.mxu1 %vm936_vm0, %v935_v2  ;;  %v817_v12 = vld [vmem:[%s1100_s2] sm:$0xff]   ;;  %v288_v15 = vld [vmem:[#allocation9] sm:$0xf] }
  0x38   :  { %v192_v13 = vld [vmem:[#allocation8] sm:$0xf]  ;;  %v523_v20 = vld [vmem:[%s1108_s10] sm:$0xf]  ;;  %811 = vset.pattern.permute.xlu1 %v938_v23  ;;  %810 = vset.pattern.permute.xlu0 %v938_v23 }
  0x39   :  { %v103_v4 = vadd.s32 16, %v1034_v3  ;;  %v104_v5 = vadd.s32 24, %v1034_v3  ;;  %v102_v6 = vadd.s32 8, %v1034_v3  ;;  %v119_v7 = vadd.s32 32, %v1034_v3  ;;  %v818_v14 = vld [vmem:[%s1101_s3] sm:$0xff]  }
  0x3a   :  { %v120_v8 = vadd.s32 40, %v1034_v3  ;;  %vm109_vm3 = vcmp.eq.s32.totalorder %v1034_v3, %v673_v9  ;;  %vm125_vm14 = vcmp.eq.s32.totalorder %v1034_v3, %v674_v10  ;;  %v707_v16 = vld [vmem:[%s1104_s6] sm:$0xff]   ;;  %v524_v24 = vunpack.c.l.bf16 %v523_v20 }
  0x3b   :  { %vm111_vm1 = vcmp.eq.s32.totalorder %v103_v4, %v673_v9  ;;  %vm112_vm2 = vcmp.eq.s32.totalorder %v104_v5, %v673_v9  ;;  %vm110_vm4 = vcmp.eq.s32.totalorder %v102_v6, %v673_v9  ;;  %vm129_vm7 = vcmp.eq.s32.totalorder %v119_v7, %v674_v10  ;;  %v711_v18 = vld [vmem:[%s1105_s7] sm:$0xff]  }
  0x3c   :  { %vm676_vm5 = vmpackc.low %vm112_vm2, %vm111_vm1  ;;  %vm130_vm8 = vcmp.eq.s32.totalorder %v120_v8, %v674_v10  ;;  %vm127_vm11 = vcmp.eq.s32.totalorder %v103_v4, %v674_v10  ;;  %vm128_vm12 = vcmp.eq.s32.totalorder %v104_v5, %v674_v10  ;;  %vm126_vm15 = vcmp.eq.s32.totalorder %v102_v6, %v674_v10  ;;  %v605_v21 = vld [vmem:[%s1109_s11] sm:$0xf]  ;;  %527 = vperm.xlu1 %811, %v524_v24  }
  0x3d   :  { %744 = vmatpush3.bf16.msk.msra.mxu0 %vm676_vm5, %v937_v11  ;;  %752 = vmatpush3.bf16.msk.msra.mxu1 %vm676_vm5, %v937_v11  ;;  %vm678_vm6 = vmpackc.low %vm110_vm4, %vm109_vm3  ;;  %vm243_vm2 = vcmask 392192   ;;  %v708_v17 = vunpack.c.l.bf16 %v707_v16  ;;  %vm344_vm3 = vcmask 130048   ;;  %v712_v19 = vunpack.c.l.bf16 %v711_v18  ;;  %v715_v22 = vld [vmem:[%s1106_s8] sm:$0xff]  }
  0x3e   :  { %745 = vmatprep.subr.bf16.mxu0 %v935_v2  ;;  %753 = vmatprep.subr.bf16.mxu1 %v935_v2  ;;  %vm687_vm10 = vmpackc.low %vm130_vm8, %vm129_vm7  ;;  %v606_v25 = vunpack.c.l.bf16 %v605_v21  ;;  %v607_v26 = vld [vmem:[%s1110_s12] sm:$0xf]  ;;  %v717_v27 = vunpack.c.h.bf16 %v715_v22  ;;  %v716_v29 = vunpack.c.l.bf16 %v715_v22  ;;  %v709_v39 = vunpack.c.h.bf16 %v707_v16 }
  0x3f   :  { %vm689_vm13 = vmpackc.low %vm128_vm12, %vm127_vm11  ;;  %v608_v28 = vunpack.c.l.bf16 %v607_v26  ;;  %v609_v31 = vld [vmem:[#allocation2] sm:$0x1]  ;;  %v713_v45 = vunpack.c.h.bf16 %v711_v18 }
  0x40   :  { %vm691_vm1 = vmpackc.low %vm126_vm15, %vm125_vm14  ;;  %514 = vperm.xlu0 %810, %v717_v27   ;;  %v610_v32 = vunpack.c.l.bf16 %v609_v31  ;;  %v521_v60 = vld [vmem:[%s1107_s9] sm:$0xf]  ;;  %s940_s9 = smov [#allocation11]  }
  0x41   :  { %746 = vmatpush3.bf16.msk.msra.mxu0 %vm678_vm6, %v937_v11  ;;  %754 = vmatpush3.bf16.msk.msra.mxu1 %vm678_vm6, %v937_v11  ;;  %v812_v30 = vpack.i.bf16 %v608_v28, %v606_v25  ;;  %v522_v0 = vunpack.c.l.bf16 %v521_v60  ;;  %s662_s11 = sshll.u32 %s940_s9, 4  ;;  %s663_s11 = int_to_ptr.vmem [resolvable:$true] %s662_s11 }
  0x42   :  { %759 = vmatprep.subr.bf16.mxu0 %v935_v2  ;;  %769 = vmatprep.subr.bf16.mxu1 %v935_v2  ;;  %s903_s12 = scalar_lea.vmem %s663_s11, 16  ;;  %s907_s27 = scalar_lea.vmem %s663_s11, 32 }
  0x43   :  { %813 = vperm.xlu1 %811, %v812_v30   ;;  %p904_p6 = scmp.ne.s32.totalorder %s663_s11, %s903_s12  ;;  %p908_p7 = scmp.lt.s32.totalorder %s663_s11, %s663_s11 }
  0x44   :  { %748 = vmatmul.mubr.msk.bf16.vlgmr.msra.gmra.mxu0 %vm147_vm9, %v817_v12  ;;  %756 = vmatmul.mubr.msk.bf16.vlgmr.msra.gmra.mxu1 %vm147_vm9, %v192_v13  ;;  %p909_p8 = scmp.lt.s32.totalorder %s907_s27, %s903_s12 }
  0x45   :  { %760 = vmatpush3.bf16.msk.msra.mxu0 %vm687_vm10, %v937_v11  ;;  %765 = vmatprep.mubr.msk.bf16.mxu0 %vm936_vm0, %v935_v2 }
  0x46   :  { %761 = vmatprep.subr.bf16.mxu0 %v935_v2  ;;  %770 = vmatpush3.bf16.msk.msra.mxu1 %vm687_vm10, %v937_v11  ;;  %p910_p9 = por %p909_p8, %p908_p7 }
  0x47   :  { %771 = vmatprep.subr.bf16.mxu1 %v935_v2  ;;  %775 = vmatprep.mubr.msk.bf16.mxu1 %vm936_vm0, %v935_v2 }
  0x48   :  { %509 = vperm.xlu0 %810, %v716_v29   ;;  %p911_p10 = pnand %p910_p9, %p904_p6 }
  0x49   :  { %762 = vmatpush3.bf16.msk.msra.mxu0 %vm689_vm13, %v937_v11 }
  0x4a   :  { %763 = vmatprep.subr.bf16.mxu0 %v935_v2  ;;  %772 = vmatpush3.bf16.msk.msra.mxu1 %vm689_vm13, %v937_v11 }
  0x4b   :  { %773 = vmatprep.subr.bf16.mxu1 %v935_v2 }
  0x4c   :  { %638 = vperm.xlu0 %810, %v610_v32  }
  0x4d   :  { %764 = vmatpush3.bf16.msk.msra.mxu0 %vm691_vm1, %v937_v11 }
  0x4e   :  { %774 = vmatpush3.bf16.msk.msra.mxu1 %vm691_vm1, %v937_v11 }
  0x50   :  { %766 = vmatmul.mubr.msk.bf16.vlgmr.msra.gmra.mxu0 %vm243_vm2, %v818_v14 }
  0x51   :  { %776 = vmatmul.mubr.msk.bf16.vlgmr.msra.gmra.mxu1 %vm243_vm2, %v288_v15  ;;  %783 = vmatprep.mubr.msk.f32.mxu0 %vm344_vm3, %v712_v19 }
  0x52   :  { %790 = vmatprep.mubr.msk.f32.mxu1 %vm344_vm3, %v708_v17  ;;  %v939_v17 = vmov 269488144  }
  0x53   :  { %v642_v18 = vunpack.c.l.s4 %v939_v17 }
  0x55   :  { %v643_v21 = vunpack.c.0.s8 %v642_v18 }
  0x57   :  { %v646_v25 = vsub.s32 %v643_v21, %v1034_v3 }
  0xb7   :  { %v528_v4 = vpop.permute.xlu1 %527 }
  0xbb   :  { %v515_v52 = vpop.permute.xlu0 %514 }
  0xbe   :  { %v814_v5 = vpop.permute.xlu1 %813 }
  0xbf   :  { %v816_v6 = vunpack.i.h.bf16 %v814_v5  ;;  %v815_v13 = vunpack.i.l.bf16 %v814_v5 }
  0xc3   :  { %v510_v61 = vpop.permute.xlu0 %509 }
  0xc7   :  { %v639_v27 = vpop.permute.xlu0 %638 }
  0xc8   :  { %v647_v30 = vrot.slane %v639_v27, %v646_v25 }
 0x104   :  { %v185_v33 = vpop.f32.mrf.mxu0  ;;  %v230_v34 = vpop.f32.mrf.mxu1 }
 0x106   :  { %v749_v35 = vpop.f32.mrf.mxu0  ;;  %v757_v36 = vpop.f32.mrf.mxu1 }
 0x108   :  { %v188_v37 = vpop.f32.mrf.mxu0  ;;  %v233_v38 = vpop.f32.mrf.mxu1 }
 0x109   :  { %786 = vmatprep.subr.mxu1 %v188_v37 }
 0x10a   :  { %v750_v40 = vpop.f32.mrf.mxu0  ;;  %787 = vmatpush3.msra.mxu1 %v188_v37  ;;  %v758_v41 = vpop.f32.mrf.mxu1 }
 0x10b   :  { %788 = vmatprep.subr.mxu1 %v185_v33 }
 0x10c   :  { %789 = vmatpush3.msra.mxu1 %v185_v33 }
 0x10d   :  { %791 = vmatmul.mubr.msk.f32.vlgmr.msra.gmra.mxu1 %vm344_vm3, %v709_v39 }
 0x110   :  { %v281_v42 = vpop.f32.mrf.mxu0 }
 0x111   :  { %v326_v47 = vpop.f32.mrf.mxu1 }
 0x112   :  { %v767_v43 = vpop.f32.mrf.mxu0  ;;  %v604_v48 = vmul.f32 %v326_v47, %v230_v34 }
 0x113   :  { %v777_v49 = vpop.f32.mrf.mxu1 }
 0x114   :  { %v284_v44 = vpop.f32.mrf.mxu0  ;;  %v628_v7 = vmul.f32 %v816_v6, %v604_v48 }
 0x115   :  { %779 = vmatprep.subr.mxu0 %v284_v44  ;;  %v329_v50 = vpop.f32.mrf.mxu1 }
 0x116   :  { %v768_v46 = vpop.f32.mrf.mxu0  ;;  %780 = vmatpush3.msra.mxu0 %v284_v44  ;;  %v629_v8 = vrot.slane %v628_v7, 4 }
 0x117   :  { %781 = vmatprep.subr.mxu0 %v281_v42  ;;  %v778_v51 = vpop.f32.mrf.mxu1 }
 0x118   :  { %782 = vmatpush3.msra.mxu0 %v281_v42  ;;  %v630_v10 = vadd.f32 %v629_v8, %v628_v7 }
 0x119   :  { %784 = vmatmul.mubr.msk.f32.vlgmr.msra.gmra.mxu0 %vm344_vm3, %v713_v45  ;;  %793 = vmatprep.subr.mxu0 %v935_v2 }
 0x11a   :  { %797 = vmatprep.mubr.msk.f32.mxu0 %vm936_vm0, %v935_v2  ;;  %v631_v15 = vrot.slane %v630_v10, 2 }
 0x1cd   :  { %v792_v53 = vpop.f32.mrf.mxu1 }
 0x1cf   :  { %v498_v57 = vpop.f32.mrf.mxu1 }
 0x1d9   :  { %v785_v54 = vpop.f32.mrf.mxu0 }
 0x1da   :  { %v504_v55 = vadd.f32 %v792_v53, %v785_v54 }
 0x1db   :  { %v417_v56 = vpop.f32.mrf.mxu0 }
 0x1dc   :  { %v518_v58 = vadd.f32 %v515_v52, %v504_v55  ;;  %v499_v59 = vadd.f32 %v498_v57, %v417_v56 }
 0x1de   :  { %v520_v62 = vmax.f32 %v518_v58, 0.0  ;;  %v517_v63 = vadd.f32 %v510_v61, %v499_v59 }
 0x1e0   :  { %v519_v1 = vmax.f32 %v517_v63, 0.0  ;;  %794 = vmatpush3.msra.mxu0 %v520_v62 }
 0x1e1   :  { %795 = vmatprep.subr.mxu0 %v935_v2  ;;  %v632_v2 = vadd.f32 %v631_v15, %v630_v10 }
 0x1e2   :  { %796 = vmatpush3.msra.mxu0 %v519_v1 }
 0x1e3   :  { %798 = vmatmul.mubr.msk.f32.vlgmr.msra.gmra.mxu0 %vm344_vm3, %v522_v0  ;;  %v633_v23 = vrot.slane %v632_v2, 1 }
 0x1e5   :  { %v634_v28 = vadd.f32 %v633_v23, %v632_v2 }
 0x2a3   :  { %v599_v9 = vpop.f32.mrf.mxu0 }
 0x2a4   :  { %v600_v11 = vadd.f32 %v599_v9, %v528_v4 }
 0x2a5   :  { %v799_v12 = vpop.f32.mrf.mxu0 }
 0x2a6   :  { %v603_v14 = vmax.f32 %v600_v11, 0.0 }
 0x2a8   :  { %v616_v16 = vmul.f32 %v815_v13, %v603_v14 }
 0x2aa   :  { %v617_v19 = vrot.slane %v616_v16, 4 }
 0x2ac   :  { %v618_v20 = vadd.f32 %v617_v19, %v616_v16 }
 0x2ae   :  { %v619_v22 = vrot.slane %v618_v20, 2 }
 0x2b0   :  { %v620_v24 = vadd.f32 %v619_v22, %v618_v20 }
 0x2b2   :  { %v621_v26 = vrot.slane %v620_v24, 1 }
 0x2b4   :  { %v622_v29 = vadd.f32 %v621_v26, %v620_v24 }
 0x2b6   :  { %v635_v31 = vadd.f32 %v634_v28, %v622_v29 }
 0x2b8   :  { %v648_v32 = vadd.f32 %v647_v30, %v635_v31 }
 0x2ba   :  { %v649_v33 = vsub.f32 0.0, %v648_v32 }
 0x2bc   :  { %v650_v34 = vmul.f32 1.442695, %v649_v33 }
 0x2be   :  { %819 = vpow2.f32 %v650_v34 }
 0x2cb   :  { %v820_v35 = vpop.eup %819 }
 0x2cc   :  { %v652_v36 = vadd.f32 1.0, %v820_v35 }
 0x2ce   :  { %821 = vrcp.f32 %v652_v36 }
 0x2db   :  { %v822_v37 = vpop.eup %821 }
 0x2dc   :  { %655 = vst [vmem:[#allocation11] sm:$0x1] %v822_v37 }
 0x2dd   :  { %914 = shalt.err (!%p911_p10)
}
 0x2de   :  { %665 = dma.vmem_to_hbm [thread:$0]  %s663_s11, 16, %s1112_s14, [#allocation5]  }
 0x2df   :  { %929 = dma.done.wait [#allocation5], 16  }
 0x2e0   :  { %930 = vsyncadd [#allocation5], 4294967280 }
 0x2e1   :  { %669 = vsyncpa [#allocation4], 1 }
 0x2e2   :  { %670 = vsyncpa [#allocation7], 1 }
 0x2e3   :  { %671 = vsyncpa [#allocation10], 1 }
 0x2e4   :  { %672 = vsyncpa [#allocation5], 1 }

</bundles_post_ra>
